<compile_context>
chip_gen: v6e
topology: v6e:2x2x1
jax: 0.10.0
libtpu: 0.0.40
codegen_flags: <defaults>
</compile_context>

<pallas_src>
import functools

import jax
import jax.numpy as jnp
from jax.experimental import pallas as pl
from jax.experimental.pallas import tpu as pltpu

LANES = 128      # vreg lane width (last dim)
SUBLANES = 8     # vreg sublane height (second-to-last dim)


def _round_up(a: int, m: int) -> int:
    return ((a + m - 1) // m) * m


def logistic_kernel(wh_ref, bh_ref, x_ref, o_ref):
    # wh_ref, bh_ref: (1,) SMEM scalars holding 0.5*w and 0.5*b.
    # x_ref / o_ref: (tile, 128) f32 tiles in VMEM.
    wh = wh_ref[0]
    bh = bh_ref[0]
    # Exact: sigmoid(x*w + b) == 0.5*tanh(0.5*x*w + 0.5*b) + 0.5.
    # One EUP tanh per vreg; no divide, no approx reciprocal.
    o_ref[...] = 0.5 * jnp.tanh(x_ref[...] * wh + bh) + 0.5


@functools.partial(jax.jit, static_argnames=("tile_rows",))
def logistic_forward(x, w, b, *, tile_rows=1024):
    """x: (N, 1) f32, w: (1,) f32, b: (1,) f32 -> (N, 1) f32."""
    N, F = x.shape
    assert F == 1
    assert tile_rows % SUBLANES == 0

    # Fold the tanh-identity 0.5 into the scalar params (two scalar muls, free).
    wh = 0.5 * w
    bh = 0.5 * b

    # ---- lane-dense repack: (N, 1) -> (rows, 128) ----
    rows = pl.cdiv(N, LANES)
    n_total = rows * LANES
    no_pad = (n_total == N)
    if no_pad:
        x2d = x.reshape(rows, LANES)                       # free reshape, no copy
    else:
        x2d = jnp.pad(x.reshape(-1), (0, n_total - N)).reshape(rows, LANES)

    # Tile selection: multiples of 8 sublanes; aim for >= 2 grid steps when
    # possible so the "parallel" axis can shard across v7x's two TensorCores.
    # Ragged last blocks are masked by Pallas.
    if rows <= SUBLANES:
        tile = rows                                        # full-array block
    else:
        tile = min(tile_rows, _round_up(pl.cdiv(rows, 2), SUBLANES))
    grid = (pl.cdiv(rows, tile),)

    # {x, out} double-buffered: only raise the scoped-VMEM limit if a caller
    # requests tiles big enough to threaten v5e's 16 MiB default.
    vmem_bytes = 2 * 2 * tile * LANES * 4
    compiler_kwargs = dict(dimension_semantics=("parallel",))
    if vmem_bytes > (12 << 20):
        compiler_kwargs["vmem_limit_bytes"] = min(vmem_bytes + (4 << 20), 100 << 20)

    out2d = pl.pallas_call(
        logistic_kernel,
        out_shape=jax.ShapeDtypeStruct((rows, LANES), x.dtype),
        grid=grid,
        in_specs=[
            pl.BlockSpec(memory_space=pltpu.SMEM),           # 0.5*w scalar
            pl.BlockSpec(memory_space=pltpu.SMEM),           # 0.5*b scalar
            pl.BlockSpec((tile, LANES), lambda i: (i, 0)),   # x row tiles
        ],
        out_specs=pl.BlockSpec((tile, LANES), lambda i: (i, 0)),
        compiler_params=pltpu.CompilerParams(**compiler_kwargs),
    )(wh, bh, x2d)

    if no_pad:
        return out2d.reshape(N, 1)                           # free reshape
    return out2d.reshape(-1)[:N].reshape(N, 1)               # strip padded tail


if __name__ == "__main__":
    key = jax.random.PRNGKey(0)
    k_w, k_b = jax.random.split(key)

    # Deterministic param init matching nn.Linear(1, 1): U(-1, 1) since fan_in=1.
    w = jax.random.uniform(k_w, (1,), jnp.float32, minval=-1.0, maxval=1.0)
    b = jax.random.uniform(k_b, (1,), jnp.float32, minval=-1.0, maxval=1.0)

    # Input consistent with the module: x = linspace(0, 10, 200), shape (200, 1).
    x = jnp.linspace(0.0, 10.0, 200, dtype=jnp.float32).reshape(200, 1)
    y_hat = jax.block_until_ready(logistic_forward(x, w, b))
    y_ref = jax.nn.sigmoid(x * w[0] + b[0])
    assert y_hat.shape == (200, 1)
    assert jnp.allclose(y_hat, y_ref, atol=1e-4), "mismatch vs reference (N=200)"

    # No-copy fast path: N % 128 == 0 (rows = 8, single full-array block).
    x_even = jnp.linspace(-3.0, 3.0, 1024, dtype=jnp.float32).reshape(1024, 1)
    y_even = jax.block_until_ready(logistic_forward(x_even, w, b))
    assert y_even.shape == (1024, 1)
    assert jnp.allclose(y_even, jax.nn.sigmoid(x_even * w[0] + b[0]),
                        atol=1e-4), "mismatch vs reference (N=1024)"

    # Ragged path: N=1300 -> rows=11, tile=8, grid=2 with a partial last block.
    x_big = jnp.linspace(-5.0, 5.0, 1300, dtype=jnp.float32).reshape(1300, 1)
    y_big = jax.block_until_ready(logistic_forward(x_big, w, b))
    assert y_big.shape == (1300, 1)
    assert jnp.allclose(y_big, jax.nn.sigmoid(x_big * w[0] + b[0]),
                        atol=1e-4), "mismatch vs reference (N=1300)"

    print("KERNEL_OK")
</pallas_src>

<mosaic_0001>
module attributes {stable_mosaic.version = 11 : i64} {
  func.func @logistic_kernel(%arg0: i32, %arg1: memref<1xf32, #tpu.memory_space<smem>>, %arg2: memref<1xf32, #tpu.memory_space<smem>>, %arg3: memref<2x128xf32, #tpu.memory_space<vmem>>, %arg4: memref<2x128xf32, #tpu.memory_space<vmem>>) attributes {dimension_semantics = [#tpu.dimension_semantics<parallel>], iteration_bounds = array<i64: 1>, scalar_prefetch = 0 : i64, scratch_operands = 0 : i64, tpu.core_type = #tpu.core_type<tc>, window_params = [{transform_indices = @transform_0, window_bounds = array<i64: 1>}, {transform_indices = @transform_1, window_bounds = array<i64: 1>}, {transform_indices = @transform_2, window_bounds = array<i64: 2, 128>}, {transform_indices = @transform_3, window_bounds = array<i64: 2, 128>}]} {
    %c0 = arith.constant 0 : index
    %0 = memref.load %arg1[%c0] : memref<1xf32, #tpu.memory_space<smem>>
    %c0_0 = arith.constant 0 : index
    %1 = memref.load %arg2[%c0_0] : memref<1xf32, #tpu.memory_space<smem>>
    %c0_1 = arith.constant 0 : index
    %c0_2 = arith.constant 0 : index
    %2 = vector.load %arg3[%c0_1, %c0_2] : memref<2x128xf32, #tpu.memory_space<vmem>>, vector<2x128xf32>
    %3 = vector.broadcast %0 : f32 to vector<2x128xf32>
    %4 = arith.mulf %2, %3 : vector<2x128xf32>
    %5 = vector.broadcast %1 : f32 to vector<2x128xf32>
    %6 = arith.addf %4, %5 : vector<2x128xf32>
    %7 = math.tanh %6 : vector<2x128xf32>
    %cst = arith.constant 5.000000e-01 : f32
    %8 = vector.broadcast %cst : f32 to vector<2x128xf32>
    %9 = arith.mulf %8, %7 : vector<2x128xf32>
    %cst_3 = arith.constant 5.000000e-01 : f32
    %10 = vector.broadcast %cst_3 : f32 to vector<2x128xf32>
    %11 = arith.addf %9, %10 : vector<2x128xf32>
    %c0_4 = arith.constant 0 : index
    %c0_5 = arith.constant 0 : index
    %12 = vector.load %arg4[%c0_4, %c0_5] : memref<2x128xf32, #tpu.memory_space<vmem>>, vector<2x128xf32>
    tpu.vector_store %arg4[%c0_4, %c0_5], %11 {strides = array<i32>} : memref<2x128xf32, #tpu.memory_space<vmem>>, vector<2x128xf32>,
    return
  }
  func.func @transform_0(%arg0: i32) -> i32 {
    %c0_i32 = arith.constant 0 : i32
    %c0_i32_0 = arith.constant 0 : i32
    return %c0_i32 : i32
  }
  func.func @transform_1(%arg0: i32) -> i32 {
    %c0_i32 = arith.constant 0 : i32
    %c0_i32_0 = arith.constant 0 : i32
    return %c0_i32 : i32
  }
  func.func @transform_2(%arg0: i32) -> (i32, i32) {
    %c0_i32 = arith.constant 0 : i32
    %c0_i32_0 = arith.constant 0 : i32
    return %arg0, %c0_i32 : i32, i32
  }
  func.func @transform_3(%arg0: i32) -> (i32, i32) {
    %c0_i32 = arith.constant 0 : i32
    %c0_i32_0 = arith.constant 0 : i32
    return %arg0, %c0_i32 : i32, i32
  }
}

</mosaic_0001>

<bundles_post_ra>
// kernel: logistic_forward.1
= control target key start
LH: loop header
LB: loop body
LE: loop exit
PB: predicated region body
PF: predicated region fallthrough
CT: control target
= control target key end

     0   :  { %s100_s0 = inlined_call_operand.<no memory space> [shape: f32[1], index: 0, kind: input, shape index: {}]   ;;  %s101_s1 = inlined_call_operand.<no memory space> [shape: f32[1], index: 1, kind: input, shape index: {}]   ;;  %s102_s2 = inlined_call_operand.vmem [shape: f32[2,128], index: 2, kind: input, shape index: {}]   ;;  %s103_s3 = inlined_call_operand.hbm [shape: f32[2,128], index: 3, kind: output, shape index: {}]  }
   0x1   :  { %v19_v0 = vld [vmem:[%s102_s2] sm:$0x3]  ;;  %v20_v1 = vstv %s100_s0  ;;  %v22_v2 = vstv %s101_s1 }
   0x2   :  { %10 = vsyncpa [#allocation5], 0  ;;  %v21_v3 = vmul.f32 %v20_v1, %v19_v0  ;;  %s67_s18 = smov [#allocation4]  }
   0x3   :  { %s34_s19 = sshll.u32 %s67_s18, 4  ;;  %s35_s19 = int_to_ptr.vmem [resolvable:$true] %s34_s19 }
   0x4   :  { %v23_v4 = vadd.f32 %v22_v2, %v21_v3  ;;  %s45_s2 = scalar_lea.vmem %s35_s19, 32  ;;  %p50_p1 = scmp.lt.s32.totalorder %s35_s19, %s35_s19 }
   0x5   :  { %p46_p0 = scmp.ne.s32.totalorder %s35_s19, %s45_s2  ;;  %p51_p2 = scmp.lt.s32.totalorder %s45_s2, %s45_s2 }
   0x6   :  { %43 = vtanh.f32 %v23_v4 }
   0x7   :  { %p52_p3 = por %p51_p2, %p50_p1 }
   0x9   :  { %p53_p4 = pnand %p52_p3, %p46_p0 }
  0x13   :  { %v44_v5 = vpop.eup %43 }
  0x14   :  { %v25_v6 = vmul.f32 0.5, %v44_v5 }
  0x16   :  { %v26_v7 = vadd.f32 0.5, %v25_v6 }
  0x18   :  { %27 = vst [vmem:[#allocation4] sm:$0x3] %v26_v7 }
  0x19   :  { %56 = shalt.err (!%p53_p4)
}
  0x1a   :  { %37 = dma.vmem_to_hbm [thread:$0]  %s35_s19, 32, %s103_s3, [#allocation5]  }
  0x1b   :  { %65 = dma.done.wait [#allocation5], 32  }
  0x1c   :  { %66 = vsyncadd [#allocation5], 4294967264 }
  0x1d   :  { %41 = vsyncpa [#allocation5], 1 }

</bundles_post_ra>
